<compile_context>
chip_gen: v6e
topology: v6e:2x2x1
jax: 0.10.0
libtpu: 0.0.40
codegen_flags: <defaults>
</compile_context>

<pallas_src>
import functools

import numpy as np
import jax
import jax.numpy as jnp
from jax.experimental import pallas as pl
from jax.experimental.pallas import tpu as pltpu


def _round_up(x, m):
    return ((x + m - 1) // m) * m


# ----------------------------------------------------------------------------
# Kernel A: input projection (nn.Linear)  --  tiled matmul over point rows
# ----------------------------------------------------------------------------
def _proj_kernel(x_ref, w_ref, b_ref, o_ref):
    o_ref[...] = (
        jnp.dot(x_ref[...], w_ref[...], preferred_element_type=jnp.float32)
        + b_ref[...]
    ).astype(o_ref.dtype)


def linear_projection(x_pad, w, b, *, tm):
    n_pad, cin = x_pad.shape
    cout = w.shape[1]
    return pl.pallas_call(
        _proj_kernel,
        out_shape=jax.ShapeDtypeStruct((n_pad, cout), jnp.float32),
        grid_spec=pltpu.PrefetchScalarGridSpec(
            num_scalar_prefetch=0,
            grid=(n_pad // tm,),
            in_specs=[
                pl.BlockSpec((tm, cin), lambda i: (i, 0)),
                pl.BlockSpec((cin, cout), lambda i: (0, 0)),
                pl.BlockSpec((1, cout), lambda i: (0, 0)),
            ],
            out_specs=pl.BlockSpec((tm, cout), lambda i: (i, 0)),
        ),
        compiler_params=pltpu.CompilerParams(dimension_semantics=("parallel",)),
    )(x_pad, w, b)


# ----------------------------------------------------------------------------
# Kernel B: in-bucket pooling (red_op = max) + LayerNorm + GELU
#   - `seps` is scalar-prefetched into SMEM (data-dependent bucket boundaries)
#   - `projected` stays in HBM (memory_space=pl.ANY); each grid step DMAs one 8-aligned
#     window covering a group of `bucket_group` contiguous buckets into a small VMEM
#     scratch, manually double-buffered across grid steps.
# ----------------------------------------------------------------------------
def _pool_norm_act_kernel(seps_ref,                       # scalar prefetch (SMEM)
                          proj_hbm, gamma_ref, beta_ref,  # inputs
                          out_ref,                        # output block
                          win_buf, dma_sem, acc_ref,      # scratch
                          *, bucket_group, eps, win, n_pad, approximate_gelu):
    g = pl.program_id(0)
    ng = pl.num_programs(0)

    def group_window_start(gi):
        start = seps_ref[gi * bucket_group]
        # 8-align and clamp so the window always stays inside the padded projected array.
        start_al = jnp.minimum((start // 8) * 8, n_pad - win)
        return pl.multiple_of(start_al, 8)

    def start_fetch(gi, slot):
        pltpu.make_async_copy(
            proj_hbm.at[pl.ds(group_window_start(gi), win), :],
            win_buf.at[slot],
            dma_sem.at[slot],
        ).start()

    # Prime the pipeline on the first step.
    @pl.when(g == 0)
    def _():
        start_fetch(0, 0)

    slot = g % 2

    # Prefetch the next group's window while pooling the current one.
    @pl.when(g + 1 < ng)
    def _():
        start_fetch(g + 1, 1 - slot)

    # Wait for the current window.
    pltpu.make_async_copy(
        proj_hbm.at[pl.ds(0, win), :], win_buf.at[slot], dma_sem.at[slot]
    ).wait()

    start_al = group_window_start(g)
    window = win_buf[slot]                                        # (win, cout)
    ridx = jax.lax.broadcasted_iota(jnp.int32, window.shape, 0)   # hoisted once

    # One masked segment-max per bucket against the single shared window.
    # Assumes every bucket has at most max_bucket rows (window sized accordingly).
    for j in range(bucket_group):                                 # static unroll
        lo = seps_ref[g * bucket_group + j] - start_al
        hi = seps_ref[g * bucket_group + j + 1] - start_al
        mask = (ridx >= lo) & (ridx < hi)
        red = jnp.max(jnp.where(mask, window, -jnp.inf), axis=0, keepdims=True)
        red = jnp.where(hi > lo, red, jnp.zeros_like(red))        # empty-bucket guard
        acc_ref[pl.ds(j, 1), :] = red

    # LayerNorm over channels + GELU on the (bucket_group, cout) tile.
    x = acc_ref[...]
    mu = jnp.mean(x, axis=-1, keepdims=True)
    var = jnp.mean(jnp.square(x - mu), axis=-1, keepdims=True)
    y = (x - mu) * jax.lax.rsqrt(var + eps)
    y = y * gamma_ref[...] + beta_ref[...]
    y = jax.nn.gelu(y, approximate=approximate_gelu)
    out_ref[...] = y.astype(out_ref.dtype)                        # single full-tile store


def bucket_pool_norm_act(seps_pad, projected_pad, gamma, beta,
                         *, max_bucket, bucket_group, eps, approximate_gelu=True):
    n_pad, cout = projected_pad.shape
    nb_pad = seps_pad.shape[0] - 1
    win = _round_up(bucket_group * max_bucket, 8) + 8
    assert n_pad >= win, "projected must be padded to at least one window"
    assert nb_pad % bucket_group == 0

    kernel = functools.partial(
        _pool_norm_act_kernel,
        bucket_group=bucket_group, eps=eps, win=win, n_pad=n_pad,
        approximate_gelu=approximate_gelu)

    return pl.pallas_call(
        kernel,
        out_shape=jax.ShapeDtypeStruct((nb_pad, cout), jnp.float32),
        grid_spec=pltpu.PrefetchScalarGridSpec(
            num_scalar_prefetch=1,
            grid=(nb_pad // bucket_group,),
            in_specs=[
                pl.BlockSpec(memory_space=pl.ANY),              # projected stays in HBM
                pl.BlockSpec((1, cout), lambda g, seps: (0, 0)),
                pl.BlockSpec((1, cout), lambda g, seps: (0, 0)),
            ],
            out_specs=pl.BlockSpec((bucket_group, cout), lambda g, seps: (g, 0)),
            scratch_shapes=[
                pltpu.VMEM((2, win, cout), jnp.float32),        # double-buffered window
                pltpu.SemaphoreType.DMA((2,)),
                pltpu.VMEM((bucket_group, cout), jnp.float32),  # reduced-row staging
            ],
        ),
        # "arbitrary": the manual double-buffer carries DMA state across grid steps.
        # TODO(synk): to exploit v7x megacore, split the grid per core (prime each core's
        # first step) before marking this axis parallel.
        compiler_params=pltpu.CompilerParams(dimension_semantics=("arbitrary",)),
    )(seps_pad, projected_pad, gamma, beta)


# ----------------------------------------------------------------------------
# PoolingWrapper.forward equivalent
# ----------------------------------------------------------------------------
def pooling_wrapper_forward(coords, input_feat, seps, w, b, gamma, beta,
                            *, max_bucket=32, tm=1024, bucket_group=8, eps=1e-5,
                            approximate_gelu=True):
    total_n, _ = input_feat.shape
    num_buckets = int(seps.shape[0]) - 1
    seps = seps.astype(jnp.int32)

    win = _round_up(bucket_group * max_bucket, 8) + 8
    # Pad rows only to the matmul tile; kernel B clamps its window to n_pad - win, so no
    # extra bucket slack is needed on the input side.
    n_pad = _round_up(max(total_n, win), tm)
    x_pad = jnp.pad(input_feat, ((0, n_pad - total_n), (0, 0)))

    # Kernel A: projection.
    projected_pad = linear_projection(x_pad, w, b, tm=tm)
    projected = projected_pad[:total_n]

    # Pad bucket count to a multiple of bucket_group (padded buckets are empty).
    nb_pad = _round_up(num_buckets, bucket_group)
    seps_pad = jnp.concatenate(
        [seps, jnp.full((nb_pad - num_buckets,), seps[-1], jnp.int32)])

    # Kernel B: in-bucket max pooling + LayerNorm + GELU.
    reduced_pad = bucket_pool_norm_act(
        seps_pad, projected_pad, gamma, beta,
        max_bucket=max_bucket, bucket_group=bucket_group, eps=eps,
        approximate_gelu=approximate_gelu)
    reduced_feat = reduced_pad[:num_buckets]

    # Auxiliary buffers (plain-JAX glue).
    pt = jnp.arange(total_n)
    unpool_ind = jnp.searchsorted(seps[1:], pt, side="right").astype(jnp.int32)
    counts = (seps[1:] - seps[:-1]).astype(coords.dtype)
    reduced_coord = (jax.ops.segment_sum(coords, unpool_ind, num_segments=num_buckets)
                     / jnp.maximum(counts, 1)[:, None])
    bbox_min = jax.ops.segment_min(coords, unpool_ind, num_segments=num_buckets)
    bbox_max = jax.ops.segment_max(coords, unpool_ind, num_segments=num_buckets)
    buffers = dict(
        bbox_min=bbox_min,
        bbox_max=bbox_max,
        reduced_sep=jnp.arange(1, num_buckets + 1, dtype=seps.dtype),
        reduced_coord=reduced_coord,
        unpool_ind=unpool_ind,
    )
    return reduced_feat, projected, buffers


# ----------------------------------------------------------------------------
if __name__ == "__main__":
    key = jax.random.PRNGKey(0)
    k_feat, k_coord, k_w, k_b = jax.random.split(key, 4)

    in_channels, out_channels = 16, 32
    total_n = 100
    max_bucket = 32
    bucket_sizes = np.array([13, 9, 17, 5, 21, 11, 8, 16], dtype=np.int32)
    assert bucket_sizes.sum() == total_n and bucket_sizes.max() <= max_bucket
    seps_np = np.concatenate([[0], np.cumsum(bucket_sizes)]).astype(np.int32)

    coords = jax.random.uniform(k_coord, (total_n, 3), jnp.float32)
    input_feat = jax.random.normal(k_feat, (total_n, in_channels), jnp.float32)
    seps = jnp.asarray(seps_np)

    # Deterministic parameters (synthetic, not a checkpoint load).
    w = jax.random.normal(k_w, (in_channels, out_channels), jnp.float32) * 0.05
    b = jax.random.normal(k_b, (1, out_channels), jnp.float32) * 0.01
    gamma = jnp.ones((1, out_channels), jnp.float32)
    beta = jnp.zeros((1, out_channels), jnp.float32)

    reduced_feat, projected, buffers = pooling_wrapper_forward(
        coords, input_feat, seps, w, b, gamma, beta, max_bucket=max_bucket)
    jax.block_until_ready((reduced_feat, projected, buffers))

    # Pure-JAX reference check.
    proj_ref = input_feat @ w + b[0]
    red_ref = jnp.stack([
        proj_ref[int(seps_np[i]):int(seps_np[i + 1])].max(axis=0)
        for i in range(len(bucket_sizes))
    ])
    mu = red_ref.mean(-1, keepdims=True)
    var = ((red_ref - mu) ** 2).mean(-1, keepdims=True)
    y_ref = (red_ref - mu) / jnp.sqrt(var + 1e-5) * gamma[0] + beta[0]
    y_ref = jax.nn.gelu(y_ref, approximate=True)

    np.testing.assert_allclose(np.asarray(projected), np.asarray(proj_ref),
                               rtol=2e-3, atol=2e-3)
    np.testing.assert_allclose(np.asarray(reduced_feat), np.asarray(y_ref),
                               rtol=2e-3, atol=2e-3)
    print("KERNEL_OK")
</pallas_src>

<mosaic_0001>
module attributes {stable_mosaic.version = 11 : i64} {
  func.func @_proj_kernel(%arg0: i32, %arg1: memref<1024x16xf32, #tpu.memory_space<vmem>>, %arg2: memref<16x32xf32, #tpu.memory_space<vmem>>, %arg3: memref<1x32xf32, #tpu.memory_space<vmem>>, %arg4: memref<1024x32xf32, #tpu.memory_space<vmem>>) attributes {dimension_semantics = [#tpu.dimension_semantics<parallel>], iteration_bounds = array<i64: 1>, scalar_prefetch = 0 : i64, scratch_operands = 0 : i64, tpu.core_type = #tpu.core_type<tc>, window_params = [{transform_indices = @transform_0, window_bounds = array<i64: 1024, 16>}, {pipeline_mode = #tpu.pipeline_mode<synchronous>, transform_indices = @transform_1, window_bounds = array<i64: 16, 32>}, {pipeline_mode = #tpu.pipeline_mode<synchronous>, transform_indices = @transform_2, window_bounds = array<i64: 1, 32>}, {transform_indices = @transform_3, window_bounds = array<i64: 1024, 32>}]} {
    %c0 = arith.constant 0 : index
    %c0_0 = arith.constant 0 : index
    %0 = vector.load %arg1[%c0, %c0_0] : memref<1024x16xf32, #tpu.memory_space<vmem>>, vector<1024x16xf32>
    %c0_1 = arith.constant 0 : index
    %c0_2 = arith.constant 0 : index
    %1 = vector.load %arg2[%c0_1, %c0_2] : memref<16x32xf32, #tpu.memory_space<vmem>>, vector<16x32xf32>
    %cst = arith.constant dense<0.000000e+00> : vector<1024x32xf32>
    %2 = tpu.matmul %0, %1, %cst {dimension_numbers = #tpu.dot_dimension_numbers<[1], [0], [0], [1], [0, 0, 1, 1], [], []>} : vector<1024x16xf32>, vector<16x32xf32>, vector<1024x32xf32> -> vector<1024x32xf32>
    %c0_3 = arith.constant 0 : index
    %c0_4 = arith.constant 0 : index
    %3 = vector.load %arg3[%c0_3, %c0_4] : memref<1x32xf32, #tpu.memory_space<vmem>>, vector<1x32xf32>
    %4 = vector.broadcast %3 : vector<1x32xf32> to vector<1024x32xf32>
    %5 = arith.addf %2, %4 : vector<1024x32xf32>
    %c0_5 = arith.constant 0 : index
    %c0_6 = arith.constant 0 : index
    %6 = vector.load %arg4[%c0_5, %c0_6] : memref<1024x32xf32, #tpu.memory_space<vmem>>, vector<1024x32xf32>
    tpu.vector_store %arg4[%c0_5, %c0_6], %5 {strides = array<i32>} : memref<1024x32xf32, #tpu.memory_space<vmem>>, vector<1024x32xf32>,
    return
  }
  func.func @transform_0(%arg0: i32) -> (i32, i32) {
    %c0_i32 = arith.constant 0 : i32
    %c0_i32_0 = arith.constant 0 : i32
    return %arg0, %c0_i32 : i32, i32
  }
  func.func @transform_1(%arg0: i32) -> (i32, i32) {
    %c0_i32 = arith.constant 0 : i32
    %c0_i32_0 = arith.constant 0 : i32
    %c0_i32_1 = arith.constant 0 : i32
    return %c0_i32, %c0_i32_0 : i32, i32
  }
  func.func @transform_2(%arg0: i32) -> (i32, i32) {
    %c0_i32 = arith.constant 0 : i32
    %c0_i32_0 = arith.constant 0 : i32
    %c0_i32_1 = arith.constant 0 : i32
    return %c0_i32, %c0_i32_0 : i32, i32
  }
  func.func @transform_3(%arg0: i32) -> (i32, i32) {
    %c0_i32 = arith.constant 0 : i32
    %c0_i32_0 = arith.constant 0 : i32
    return %arg0, %c0_i32 : i32, i32
  }
}

</mosaic_0001>

<bundles_post_ra>
// kernel: tpu_custom_call.1
= control target key start
LH: loop header
LB: loop body
LE: loop exit
PB: predicated region body
PF: predicated region fallthrough
CT: control target
= control target key end

     0   :  { %vm151_vm0 = vcmask 130048   ;;  %vm1241_vm1 = vcmask 261120   ;;  %s3016_s1 = inlined_call_operand.vmem [shape: f32[16,32], index: 1, kind: input, shape index: {}]   ;;  %s3017_s0 = inlined_call_operand.vmem [shape: f32[1024,16], index: 0, kind: input, shape index: {}]   ;;  %s3018_s2 = inlined_call_operand.vmem [shape: f32[1,32], index: 2, kind: input, shape index: {}]   ;;  %s3019_s3 = inlined_call_operand.vmem [shape: f32[1024,32], index: 3, kind: output, shape index: {}]  }
   0x1   :  { %v143_v0 = vld [vmem:[%s3016_s1 + $0x8] sm:$0xff]  ;;  %v142_v1 = vld [vmem:[%s3016_s1] sm:$0xff]  ;;  %v16_v6 = vld [vmem:[%s3017_s0 + $0x10] sm:$0xff] }
   0x2   :  { %1633 = vmatprep.subr.mxu0 %v143_v0  ;;  %1829 = vmatprep.subr.mxu1 %v143_v0  ;;  %v14_v2 = vld [vmem:[%s3017_s0] sm:$0xff]  ;;  %v15_v4 = vld [vmem:[%s3017_s0 + $0x8] sm:$0xff]  ;;  %v80_v7 = vld [vmem:[%s3017_s0 + $0x210] sm:$0xff] }
   0x3   :  { %1634 = vmatpush3.msra.mxu0 %v143_v0  ;;  %1831 = vmatpush3.msra.mxu1 %v143_v0  ;;  %v78_v3 = vld [vmem:[%s3017_s0 + $0x200] sm:$0xff]  ;;  %v79_v5 = vld [vmem:[%s3017_s0 + $0x208] sm:$0xff]  ;;  %v17_v8 = vld [vmem:[%s3017_s0 + $0x18] sm:$0xff] }
   0x4   :  { %1635 = vmatprep.subr.mxu0 %v142_v1  ;;  %1830 = vmatprep.subr.mxu1 %v142_v1  ;;  %v81_v9 = vld [vmem:[%s3017_s0 + $0x218] sm:$0xff]  ;;  %v18_v10 = vld [vmem:[%s3017_s0 + $0x20] sm:$0xff]  ;;  %v19_v12 = vld [vmem:[%s3017_s0 + $0x28] sm:$0xff] }
   0x5   :  { %1636 = vmatpush3.msra.mxu0 %v142_v1  ;;  %1832 = vmatpush3.msra.mxu1 %v142_v1  ;;  %v82_v11 = vld [vmem:[%s3017_s0 + $0x220] sm:$0xff]  ;;  %v83_v13 = vld [vmem:[%s3017_s0 + $0x228] sm:$0xff]  ;;  %v20_v14 = vld [vmem:[%s3017_s0 + $0x30] sm:$0xff] }
   0x6   :  { %1637 = vmatprep.mubr.msk.f32.mxu0 %vm151_vm0, %v14_v2  ;;  %1733 = vmatprep.mubr.msk.f32.mxu1 %vm151_vm0, %v78_v3  ;;  %v84_v15 = vld [vmem:[%s3017_s0 + $0x230] sm:$0xff]  ;;  %v21_v16 = vld [vmem:[%s3017_s0 + $0x38] sm:$0xff]  ;;  %v22_v18 = vld [vmem:[%s3017_s0 + $0x40] sm:$0xff] }
   0x7   :  { %1638 = vmatmul.mubr.msk.f32.vlgmr.msra.gmra.mxu0 %vm151_vm0, %v15_v4  ;;  %1734 = vmatmul.mubr.msk.f32.vlgmr.msra.gmra.mxu1 %vm151_vm0, %v79_v5  ;;  %v85_v17 = vld [vmem:[%s3017_s0 + $0x238] sm:$0xff]  ;;  %v86_v19 = vld [vmem:[%s3017_s0 + $0x240] sm:$0xff]  ;;  %v23_v20 = vld [vmem:[%s3017_s0 + $0x48] sm:$0xff] }
   0x8   :  { %1640 = vmatprep.mubr.msk.f32.mxu0 %vm151_vm0, %v16_v6  ;;  %1736 = vmatprep.mubr.msk.f32.mxu1 %vm151_vm0, %v80_v7  ;;  %v87_v21 = vld [vmem:[%s3017_s0 + $0x248] sm:$0xff]  ;;  %v24_v22 = vld [vmem:[%s3017_s0 + $0x50] sm:$0xff]  ;;  %v25_v24 = vld [vmem:[%s3017_s0 + $0x58] sm:$0xff] }
   0x9   :  { %v88_v23 = vld [vmem:[%s3017_s0 + $0x250] sm:$0xff]  ;;  %v89_v25 = vld [vmem:[%s3017_s0 + $0x258] sm:$0xff]  ;;  %v26_v26 = vld [vmem:[%s3017_s0 + $0x60] sm:$0xff] }
   0xa   :  { %v90_v27 = vld [vmem:[%s3017_s0 + $0x260] sm:$0xff]  ;;  %v27_v28 = vld [vmem:[%s3017_s0 + $0x68] sm:$0xff]  ;;  %v28_v30 = vld [vmem:[%s3017_s0 + $0x70] sm:$0xff] }
   0xb   :  { %1641 = vmatmul.mubr.msk.f32.gmra.mxu0 %vm151_vm0, %v17_v8  ;;  %1737 = vmatmul.mubr.msk.f32.gmra.mxu1 %vm151_vm0, %v81_v9  ;;  %v91_v29 = vld [vmem:[%s3017_s0 + $0x268] sm:$0xff]  ;;  %v92_v31 = vld [vmem:[%s3017_s0 + $0x270] sm:$0xff]  ;;  %v29_v32 = vld [vmem:[%s3017_s0 + $0x78] sm:$0xff] }
   0xc   :  { %1643 = vmatprep.mubr.msk.f32.mxu0 %vm151_vm0, %v18_v10  ;;  %1739 = vmatprep.mubr.msk.f32.mxu1 %vm151_vm0, %v82_v11  ;;  %v93_v33 = vld [vmem:[%s3017_s0 + $0x278] sm:$0xff]  ;;  %v30_v34 = vld [vmem:[%s3017_s0 + $0x80] sm:$0xff]  ;;  %v31_v36 = vld [vmem:[%s3017_s0 + $0x88] sm:$0xff] }
   0xd   :  { %v94_v35 = vld [vmem:[%s3017_s0 + $0x280] sm:$0xff]  ;;  %v95_v37 = vld [vmem:[%s3017_s0 + $0x288] sm:$0xff]  ;;  %v32_v38 = vld [vmem:[%s3017_s0 + $0x90] sm:$0xff] }
   0xe   :  { %v96_v39 = vld [vmem:[%s3017_s0 + $0x290] sm:$0xff]  ;;  %v33_v40 = vld [vmem:[%s3017_s0 + $0x98] sm:$0xff]  ;;  %v34_v42 = vld [vmem:[%s3017_s0 + $0xa0] sm:$0xff] }
   0xf   :  { %1644 = vmatmul.mubr.msk.f32.gmra.mxu0 %vm151_vm0, %v19_v12  ;;  %1740 = vmatmul.mubr.msk.f32.gmra.mxu1 %vm151_vm0, %v83_v13  ;;  %v97_v41 = vld [vmem:[%s3017_s0 + $0x298] sm:$0xff]  ;;  %v98_v43 = vld [vmem:[%s3017_s0 + $0x2a0] sm:$0xff]  ;;  %v35_v44 = vld [vmem:[%s3017_s0 + $0xa8] sm:$0xff] }
  0x10   :  { %1646 = vmatprep.mubr.msk.f32.mxu0 %vm151_vm0, %v20_v14  ;;  %1742 = vmatprep.mubr.msk.f32.mxu1 %vm151_vm0, %v84_v15  ;;  %v99_v45 = vld [vmem:[%s3017_s0 + $0x2a8] sm:$0xff]  ;;  %v36_v46 = vld [vmem:[%s3017_s0 + $0xb0] sm:$0xff]  ;;  %v37_v48 = vld [vmem:[%s3017_s0 + $0xb8] sm:$0xff] }
  0x11   :  { %v100_v47 = vld [vmem:[%s3017_s0 + $0x2b0] sm:$0xff]  ;;  %v101_v49 = vld [vmem:[%s3017_s0 + $0x2b8] sm:$0xff]  ;;  %v38_v50 = vld [vmem:[%s3017_s0 + $0xc0] sm:$0xff] }
  0x12   :  { %v102_v51 = vld [vmem:[%s3017_s0 + $0x2c0] sm:$0xff]  ;;  %v39_v52 = vld [vmem:[%s3017_s0 + $0xc8] sm:$0xff]  ;;  %v40_v54 = vld [vmem:[%s3017_s0 + $0xd0] sm:$0xff] }
  0x13   :  { %1647 = vmatmul.mubr.msk.f32.gmra.mxu0 %vm151_vm0, %v21_v16  ;;  %1743 = vmatmul.mubr.msk.f32.gmra.mxu1 %vm151_vm0, %v85_v17  ;;  %v103_v53 = vld [vmem:[%s3017_s0 + $0x2c8] sm:$0xff]  ;;  %v104_v55 = vld [vmem:[%s3017_s0 + $0x2d0] sm:$0xff]  ;;  %v41_v56 = vld [vmem:[%s3017_s0 + $0xd8] sm:$0xff] }
  0x14   :  { %1649 = vmatprep.mubr.msk.f32.mxu0 %vm151_vm0, %v22_v18  ;;  %1745 = vmatprep.mubr.msk.f32.mxu1 %vm151_vm0, %v86_v19  ;;  %v105_v57 = vld [vmem:[%s3017_s0 + $0x2d8] sm:$0xff]  ;;  %v42_v58 = vld [vmem:[%s3017_s0 + $0xe0] sm:$0xff]  ;;  %v43_v60 = vld [vmem:[%s3017_s0 + $0xe8] sm:$0xff] }
  0x15   :  { %v106_v59 = vld [vmem:[%s3017_s0 + $0x2e0] sm:$0xff]  ;;  %v107_v61 = vld [vmem:[%s3017_s0 + $0x2e8] sm:$0xff]  ;;  %v44_v62 = vld [vmem:[%s3017_s0 + $0xf0] sm:$0xff] }
  0x16   :  { %v108_v63 = vld [vmem:[%s3017_s0 + $0x2f0] sm:$0xff]  ;;  %v45_v0 = vld [vmem:[%s3017_s0 + $0xf8] sm:$0xff]  ;;  %v46_v2 = vld [vmem:[%s3017_s0 + $0x100] sm:$0xff] }
  0x17   :  { %1650 = vmatmul.mubr.msk.f32.gmra.mxu0 %vm151_vm0, %v23_v20  ;;  %1746 = vmatmul.mubr.msk.f32.gmra.mxu1 %vm151_vm0, %v87_v21  ;;  %v109_v1 = vld [vmem:[%s3017_s0 + $0x2f8] sm:$0xff]  ;;  %v110_v3 = vld [vmem:[%s3017_s0 + $0x300] sm:$0xff]  ;;  %v47_v4 = vld [vmem:[%s3017_s0 + $0x108] sm:$0xff] }
  0x18   :  { %1652 = vmatprep.mubr.msk.f32.mxu0 %vm151_vm0, %v24_v22  ;;  %1748 = vmatprep.mubr.msk.f32.mxu1 %vm151_vm0, %v88_v23  ;;  %v111_v5 = vld [vmem:[%s3017_s0 + $0x308] sm:$0xff]  ;;  %v48_v6 = vld [vmem:[%s3017_s0 + $0x110] sm:$0xff]  ;;  %v49_v8 = vld [vmem:[%s3017_s0 + $0x118] sm:$0xff] }
  0x19   :  { %v112_v7 = vld [vmem:[%s3017_s0 + $0x310] sm:$0xff]  ;;  %v113_v9 = vld [vmem:[%s3017_s0 + $0x318] sm:$0xff]  ;;  %v50_v10 = vld [vmem:[%s3017_s0 + $0x120] sm:$0xff] }
  0x1a   :  { %v114_v11 = vld [vmem:[%s3017_s0 + $0x320] sm:$0xff]  ;;  %v51_v12 = vld [vmem:[%s3017_s0 + $0x128] sm:$0xff]  ;;  %v52_v14 = vld [vmem:[%s3017_s0 + $0x130] sm:$0xff] }
  0x1b   :  { %1653 = vmatmul.mubr.msk.f32.gmra.mxu0 %vm151_vm0, %v25_v24  ;;  %1749 = vmatmul.mubr.msk.f32.gmra.mxu1 %vm151_vm0, %v89_v25  ;;  %v115_v13 = vld [vmem:[%s3017_s0 + $0x328] sm:$0xff]  ;;  %v116_v15 = vld [vmem:[%s3017_s0 + $0x330] sm:$0xff]  ;;  %v53_v16 = vld [vmem:[%s3017_s0 + $0x138] sm:$0xff] }
  0x1c   :  { %1655 = vmatprep.mubr.msk.f32.mxu0 %vm151_vm0, %v26_v26  ;;  %1751 = vmatprep.mubr.msk.f32.mxu1 %vm151_vm0, %v90_v27  ;;  %v117_v17 = vld [vmem:[%s3017_s0 + $0x338] sm:$0xff]  ;;  %v54_v18 = vld [vmem:[%s3017_s0 + $0x140] sm:$0xff]  ;;  %v55_v20 = vld [vmem:[%s3017_s0 + $0x148] sm:$0xff] }
  0x1d   :  { %v118_v19 = vld [vmem:[%s3017_s0 + $0x340] sm:$0xff]  ;;  %v119_v21 = vld [vmem:[%s3017_s0 + $0x348] sm:$0xff]  ;;  %v56_v22 = vld [vmem:[%s3017_s0 + $0x150] sm:$0xff] }
  0x1e   :  { %v120_v23 = vld [vmem:[%s3017_s0 + $0x350] sm:$0xff]  ;;  %v57_v24 = vld [vmem:[%s3017_s0 + $0x158] sm:$0xff]  ;;  %v58_v26 = vld [vmem:[%s3017_s0 + $0x160] sm:$0xff] }
  0x1f   :  { %1656 = vmatmul.mubr.msk.f32.gmra.mxu0 %vm151_vm0, %v27_v28  ;;  %1752 = vmatmul.mubr.msk.f32.gmra.mxu1 %vm151_vm0, %v91_v29  ;;  %v121_v25 = vld [vmem:[%s3017_s0 + $0x358] sm:$0xff]  ;;  %v122_v27 = vld [vmem:[%s3017_s0 + $0x360] sm:$0xff]  ;;  %v59_v28 = vld [vmem:[%s3017_s0 + $0x168] sm:$0xff] }
  0x20   :  { %1658 = vmatprep.mubr.msk.f32.mxu0 %vm151_vm0, %v28_v30  ;;  %1754 = vmatprep.mubr.msk.f32.mxu1 %vm151_vm0, %v92_v31  ;;  %v123_v29 = vld [vmem:[%s3017_s0 + $0x368] sm:$0xff]  ;;  %v60_v30 = vld [vmem:[%s3017_s0 + $0x170] sm:$0xff] }
  0x21   :  { %v124_v31 = vld [vmem:[%s3017_s0 + $0x370] sm:$0xff] }
  0x23   :  { %1659 = vmatmul.mubr.msk.f32.gmra.mxu0 %vm151_vm0, %v29_v32  ;;  %1755 = vmatmul.mubr.msk.f32.gmra.mxu1 %vm151_vm0, %v93_v33  ;;  %v61_v32 = vld [vmem:[%s3017_s0 + $0x178] sm:$0xff] }
  0x24   :  { %1661 = vmatprep.mubr.msk.f32.mxu0 %vm151_vm0, %v30_v34  ;;  %1757 = vmatprep.mubr.msk.f32.mxu1 %vm151_vm0, %v94_v35  ;;  %v125_v33 = vld [vmem:[%s3017_s0 + $0x378] sm:$0xff]  ;;  %v62_v34 = vld [vmem:[%s3017_s0 + $0x180] sm:$0xff] }
  0x25   :  { %v126_v35 = vld [vmem:[%s3017_s0 + $0x380] sm:$0xff] }
  0x27   :  { %1662 = vmatmul.mubr.msk.f32.gmra.mxu0 %vm151_vm0, %v31_v36  ;;  %1758 = vmatmul.mubr.msk.f32.gmra.mxu1 %vm151_vm0, %v95_v37  ;;  %v63_v36 = vld [vmem:[%s3017_s0 + $0x188] sm:$0xff] }
  0x28   :  { %1664 = vmatprep.mubr.msk.f32.mxu0 %vm151_vm0, %v32_v38  ;;  %1760 = vmatprep.mubr.msk.f32.mxu1 %vm151_vm0, %v96_v39  ;;  %v127_v37 = vld [vmem:[%s3017_s0 + $0x388] sm:$0xff]  ;;  %v64_v38 = vld [vmem:[%s3017_s0 + $0x190] sm:$0xff] }
  0x29   :  { %v128_v39 = vld [vmem:[%s3017_s0 + $0x390] sm:$0xff] }
  0x2b   :  { %1665 = vmatmul.mubr.msk.f32.gmra.mxu0 %vm151_vm0, %v33_v40  ;;  %1761 = vmatmul.mubr.msk.f32.gmra.mxu1 %vm151_vm0, %v97_v41  ;;  %v65_v40 = vld [vmem:[%s3017_s0 + $0x198] sm:$0xff] }
  0x2c   :  { %1667 = vmatprep.mubr.msk.f32.mxu0 %vm151_vm0, %v34_v42  ;;  %1763 = vmatprep.mubr.msk.f32.mxu1 %vm151_vm0, %v98_v43  ;;  %v129_v41 = vld [vmem:[%s3017_s0 + $0x398] sm:$0xff]  ;;  %v66_v42 = vld [vmem:[%s3017_s0 + $0x1a0] sm:$0xff] }
  0x2d   :  { %v130_v43 = vld [vmem:[%s3017_s0 + $0x3a0] sm:$0xff] }
  0x2f   :  { %1668 = vmatmul.mubr.msk.f32.gmra.mxu0 %vm151_vm0, %v35_v44  ;;  %1764 = vmatmul.mubr.msk.f32.gmra.mxu1 %vm151_vm0, %v99_v45  ;;  %v67_v44 = vld [vmem:[%s3017_s0 + $0x1a8] sm:$0xff] }
  0x30   :  { %1670 = vmatprep.mubr.msk.f32.mxu0 %vm151_vm0, %v36_v46  ;;  %1766 = vmatprep.mubr.msk.f32.mxu1 %vm151_vm0, %v100_v47  ;;  %v131_v45 = vld [vmem:[%s3017_s0 + $0x3a8] sm:$0xff]  ;;  %v68_v46 = vld [vmem:[%s3017_s0 + $0x1b0] sm:$0xff] }
  0x31   :  { %v132_v47 = vld [vmem:[%s3017_s0 + $0x3b0] sm:$0xff] }
  0x33   :  { %1671 = vmatmul.mubr.msk.f32.gmra.mxu0 %vm151_vm0, %v37_v48  ;;  %1767 = vmatmul.mubr.msk.f32.gmra.mxu1 %vm151_vm0, %v101_v49  ;;  %v69_v48 = vld [vmem:[%s3017_s0 + $0x1b8] sm:$0xff] }
  0x34   :  { %1673 = vmatprep.mubr.msk.f32.mxu0 %vm151_vm0, %v38_v50  ;;  %1769 = vmatprep.mubr.msk.f32.mxu1 %vm151_vm0, %v102_v51  ;;  %v133_v49 = vld [vmem:[%s3017_s0 + $0x3b8] sm:$0xff]  ;;  %v70_v50 = vld [vmem:[%s3017_s0 + $0x1c0] sm:$0xff] }
  0x35   :  { %v134_v51 = vld [vmem:[%s3017_s0 + $0x3c0] sm:$0xff] }
  0x37   :  { %1674 = vmatmul.mubr.msk.f32.gmra.mxu0 %vm151_vm0, %v39_v52  ;;  %1770 = vmatmul.mubr.msk.f32.gmra.mxu1 %vm151_vm0, %v103_v53  ;;  %v71_v52 = vld [vmem:[%s3017_s0 + $0x1c8] sm:$0xff] }
  0x38   :  { %1676 = vmatprep.mubr.msk.f32.mxu0 %vm151_vm0, %v40_v54  ;;  %1772 = vmatprep.mubr.msk.f32.mxu1 %vm151_vm0, %v104_v55  ;;  %v135_v53 = vld [vmem:[%s3017_s0 + $0x3c8] sm:$0xff]  ;;  %v72_v54 = vld [vmem:[%s3017_s0 + $0x1d0] sm:$0xff] }
  0x39   :  { %v136_v55 = vld [vmem:[%s3017_s0 + $0x3d0] sm:$0xff] }
  0x3b   :  { %1677 = vmatmul.mubr.msk.f32.gmra.mxu0 %vm151_vm0, %v41_v56  ;;  %1773 = vmatmul.mubr.msk.f32.gmra.mxu1 %vm151_vm0, %v105_v57  ;;  %v73_v56 = vld [vmem:[%s3017_s0 + $0x1d8] sm:$0xff] }
  0x3c   :  { %1679 = vmatprep.mubr.msk.f32.mxu0 %vm151_vm0, %v42_v58  ;;  %1775 = vmatprep.mubr.msk.f32.mxu1 %vm151_vm0, %v106_v59  ;;  %v137_v57 = vld [vmem:[%s3017_s0 + $0x3d8] sm:$0xff]  ;;  %v74_v58 = vld [vmem:[%s3017_s0 + $0x1e0] sm:$0xff] }
  0x3d   :  { %v138_v59 = vld [vmem:[%s3017_s0 + $0x3e0] sm:$0xff] }
  0x3f   :  { %1680 = vmatmul.mubr.msk.f32.gmra.mxu0 %vm151_vm0, %v43_v60  ;;  %1776 = vmatmul.mubr.msk.f32.gmra.mxu1 %vm151_vm0, %v107_v61  ;;  %v75_v60 = vld [vmem:[%s3017_s0 + $0x1e8] sm:$0xff] }
  0x40   :  { %1682 = vmatprep.mubr.msk.f32.mxu0 %vm151_vm0, %v44_v62  ;;  %1778 = vmatprep.mubr.msk.f32.mxu1 %vm151_vm0, %v108_v63  ;;  %v139_v61 = vld [vmem:[%s3017_s0 + $0x3e8] sm:$0xff]  ;;  %v76_v62 = vld [vmem:[%s3017_s0 + $0x1f0] sm:$0xff] }
  0x41   :  { %v140_v63 = vld [vmem:[%s3017_s0 + $0x3f0] sm:$0xff] }
  0x43   :  { %1683 = vmatmul.mubr.msk.f32.gmra.mxu0 %vm151_vm0, %v45_v0  ;;  %1779 = vmatmul.mubr.msk.f32.gmra.mxu1 %vm151_vm0, %v109_v1  ;;  %v77_v0 = vld [vmem:[%s3017_s0 + $0x1f8] sm:$0xff] }
  0x44   :  { %1685 = vmatprep.mubr.msk.f32.mxu0 %vm151_vm0, %v46_v2  ;;  %1781 = vmatprep.mubr.msk.f32.mxu1 %vm151_vm0, %v110_v3  ;;  %v141_v1 = vld [vmem:[%s3017_s0 + $0x3f8] sm:$0xff]  ;;  %v2374_v2 = vld [vmem:[%s3018_s2] ss:$0 sm:$0xff] }
  0x47   :  { %1686 = vmatmul.mubr.msk.f32.gmra.mxu0 %vm151_vm0, %v47_v4  ;;  %1782 = vmatmul.mubr.msk.f32.gmra.mxu1 %vm151_vm0, %v111_v5 }
  0x48   :  { %1688 = vmatprep.mubr.msk.f32.mxu0 %vm151_vm0, %v48_v6  ;;  %1784 = vmatprep.mubr.msk.f32.mxu1 %vm151_vm0, %v112_v7 }
  0x4b   :  { %1689 = vmatmul.mubr.msk.f32.gmra.mxu0 %vm151_vm0, %v49_v8  ;;  %1785 = vmatmul.mubr.msk.f32.gmra.mxu1 %vm151_vm0, %v113_v9 }
  0x4c   :  { %1691 = vmatprep.mubr.msk.f32.mxu0 %vm151_vm0, %v50_v10  ;;  %1787 = vmatprep.mubr.msk.f32.mxu1 %vm151_vm0, %v114_v11 }
  0x4f   :  { %1692 = vmatmul.mubr.msk.f32.gmra.mxu0 %vm151_vm0, %v51_v12  ;;  %1788 = vmatmul.mubr.msk.f32.gmra.mxu1 %vm151_vm0, %v115_v13 }
  0x50   :  { %1694 = vmatprep.mubr.msk.f32.mxu0 %vm151_vm0, %v52_v14  ;;  %1790 = vmatprep.mubr.msk.f32.mxu1 %vm151_vm0, %v116_v15 }
  0x53   :  { %1695 = vmatmul.mubr.msk.f32.gmra.mxu0 %vm151_vm0, %v53_v16  ;;  %1791 = vmatmul.mubr.msk.f32.gmra.mxu1 %vm151_vm0, %v117_v17 }
  0x54   :  { %1697 = vmatprep.mubr.msk.f32.mxu0 %vm151_vm0, %v54_v18  ;;  %1793 = vmatprep.mubr.msk.f32.mxu1 %vm151_vm0, %v118_v19 }
  0x57   :  { %1698 = vmatmul.mubr.msk.f32.gmra.mxu0 %vm151_vm0, %v55_v20  ;;  %1794 = vmatmul.mubr.msk.f32.gmra.mxu1 %vm151_vm0, %v119_v21 }
  0x58   :  { %1700 = vmatprep.mubr.msk.f32.mxu0 %vm151_vm0, %v56_v22  ;;  %1796 = vmatprep.mubr.msk.f32.mxu1 %vm151_vm0, %v120_v23 }
  0x5b   :  { %1701 = vmatmul.mubr.msk.f32.gmra.mxu0 %vm151_vm0, %v57_v24  ;;  %1797 = vmatmul.mubr.msk.f32.gmra.mxu1 %vm151_vm0, %v121_v25 }
  0x5c   :  { %1703 = vmatprep.mubr.msk.f32.mxu0 %vm151_vm0, %v58_v26  ;;  %1799 = vmatprep.mubr.msk.f32.mxu1 %vm151_vm0, %v122_v27 }
  0x5f   :  { %1704 = vmatmul.mubr.msk.f32.gmra.mxu0 %vm151_vm0, %v59_v28  ;;  %1800 = vmatmul.mubr.msk.f32.gmra.mxu1 %vm151_vm0, %v123_v29 }
  0x60   :  { %1706 = vmatprep.mubr.msk.f32.mxu0 %vm151_vm0, %v60_v30  ;;  %1802 = vmatprep.mubr.msk.f32.mxu1 %vm151_vm0, %v124_v31 }
  0x63   :  { %1707 = vmatmul.mubr.msk.f32.gmra.mxu0 %vm151_vm0, %v61_v32  ;;  %1803 = vmatmul.mubr.msk.f32.gmra.mxu1 %vm151_vm0, %v125_v33 }
  0x64   :  { %1709 = vmatprep.mubr.msk.f32.mxu0 %vm151_vm0, %v62_v34  ;;  %1805 = vmatprep.mubr.msk.f32.mxu1 %vm151_vm0, %v126_v35 }
  0x67   :  { %1710 = vmatmul.mubr.msk.f32.gmra.mxu0 %vm151_vm0, %v63_v36  ;;  %1806 = vmatmul.mubr.msk.f32.gmra.mxu1 %vm151_vm0, %v127_v37 }
  0x68   :  { %1712 = vmatprep.mubr.msk.f32.mxu0 %vm151_vm0, %v64_v38  ;;  %1808 = vmatprep.mubr.msk.f32.mxu1 %vm151_vm0, %v128_v39 }
  0x6b   :  { %1713 = vmatmul.mubr.msk.f32.gmra.mxu0 %vm151_vm0, %v65_v40  ;;  %1809 = vmatmul.mubr.msk.f32.gmra.mxu1 %vm151_vm0, %v129_v41 }
  0x6c   :  { %1715 = vmatprep.mubr.msk.f32.mxu0 %vm151_vm0, %v66_v42  ;;  %1811 = vmatprep.mubr.msk.f32.mxu1 %vm151_vm0, %v130_v43 }
  0x6f   :  { %1716 = vmatmul.mubr.msk.f32.gmra.mxu0 %vm151_vm0, %v67_v44  ;;  %1812 = vmatmul.mubr.msk.f32.gmra.mxu1 %vm151_vm0, %v131_v45 }
  0x70   :  { %1718 = vmatprep.mubr.msk.f32.mxu0 %vm151_vm0, %v68_v46  ;;  %1814 = vmatprep.mubr.msk.f32.mxu1 %vm151_vm0, %v132_v47 }
  0x73   :  { %1719 = vmatmul.mubr.msk.f32.gmra.mxu0 %vm151_vm0, %v69_v48  ;;  %1815 = vmatmul.mubr.msk.f32.gmra.mxu1 %vm151_vm0, %v133_v49 }
  0x74   :  { %1721 = vmatprep.mubr.msk.f32.mxu0 %vm151_vm0, %v70_v50  ;;  %1817 = vmatprep.mubr.msk.f32.mxu1 %vm151_vm0, %v134_v51 }
  0x77   :  { %1722 = vmatmul.mubr.msk.f32.gmra.mxu0 %vm151_vm0, %v71_v52  ;;  %1818 = vmatmul.mubr.msk.f32.gmra.mxu1 %vm151_vm0, %v135_v53 }
  0x78   :  { %1724 = vmatprep.mubr.msk.f32.mxu0 %vm151_vm0, %v72_v54  ;;  %1820 = vmatprep.mubr.msk.f32.mxu1 %vm151_vm0, %v136_v55 }
  0x7b   :  { %1725 = vmatmul.mubr.msk.f32.gmra.mxu0 %vm151_vm0, %v73_v56  ;;  %1821 = vmatmul.mubr.msk.f32.gmra.mxu1 %vm151_vm0, %v137_v57 }
  0x7c   :  { %1727 = vmatprep.mubr.msk.f32.mxu0 %vm151_vm0, %v74_v58  ;;  %1823 = vmatprep.mubr.msk.f32.mxu1 %vm151_vm0, %v138_v59 }
  0x7f   :  { %1728 = vmatmul.mubr.msk.f32.gmra.mxu0 %vm151_vm0, %v75_v60  ;;  %1824 = vmatmul.mubr.msk.f32.gmra.mxu1 %vm151_vm0, %v139_v61 }
  0x80   :  { %1730 = vmatprep.mubr.msk.f32.mxu0 %vm151_vm0, %v76_v62  ;;  %1826 = vmatprep.mubr.msk.f32.mxu1 %vm151_vm0, %v140_v63 }
  0x83   :  { %1731 = vmatmul.mubr.msk.f32.gmra.mxu0 %vm151_vm0, %v77_v0  ;;  %1827 = vmatmul.mubr.msk.f32.gmra.mxu1 %vm151_vm0, %v141_v1 }
  0xc7   :  { %v1639_v3 = vpop.f32.mrf.mxu0  ;;  %v1735_v4 = vpop.f32.mrf.mxu1 }
  0xc8   :  { %v608_v5 = vadd.f32 %v1639_v3, %v2374_v2  ;;  %v928_v6 = vadd.f32 %v1735_v4, %v2374_v2 }
  0xc9   :  { %v602_v7 = vpop.f32.mrf.mxu0  ;;  %v922_v8 = vpop.f32.mrf.mxu1 }
  0xca   :  { %1243 = vst.msk [vmem:[%s3019_s3 + $0x8] sm:$0xff] %vm1241_vm1, %v608_v5  ;;  %1307 = vst.msk [vmem:[%s3019_s3 + $0x208] sm:$0xff] %vm1241_vm1, %v928_v6  ;;  %v603_v9 = vadd.f32 %v2374_v2, %v602_v7  ;;  %v923_v10 = vadd.f32 %v2374_v2, %v922_v8 }
  0xcb   :  { %v1642_v11 = vpop.f32.mrf.mxu0  ;;  %v1738_v12 = vpop.f32.mrf.mxu1 }
  0xcc   :  { %1242 = vst.msk [vmem:[%s3019_s3] sm:$0xff] %vm1241_vm1, %v603_v9  ;;  %1306 = vst.msk [vmem:[%s3019_s3 + $0x200] sm:$0xff] %vm1241_vm1, %v923_v10  ;;  %v618_v13 = vadd.f32 %v1642_v11, %v2374_v2  ;;  %v938_v14 = vadd.f32 %v1738_v12, %v2374_v2 }
  0xcd   :  { %v612_v15 = vpop.f32.mrf.mxu0  ;;  %v932_v16 = vpop.f32.mrf.mxu1 }
  0xce   :  { %1245 = vst.msk [vmem:[%s3019_s3 + $0x18] sm:$0xff] %vm1241_vm1, %v618_v13  ;;  %1309 = vst.msk [vmem:[%s3019_s3 + $0x218] sm:$0xff] %vm1241_vm1, %v938_v14  ;;  %v613_v17 = vadd.f32 %v2374_v2, %v612_v15  ;;  %v933_v18 = vadd.f32 %v2374_v2, %v932_v16 }
  0xcf   :  { %v1645_v19 = vpop.f32.mrf.mxu0  ;;  %v1741_v20 = vpop.f32.mrf.mxu1 }
  0xd0   :  { %1244 = vst.msk [vmem:[%s3019_s3 + $0x10] sm:$0xff] %vm1241_vm1, %v613_v17  ;;  %1308 = vst.msk [vmem:[%s3019_s3 + $0x210] sm:$0xff] %vm1241_vm1, %v933_v18  ;;  %v628_v21 = vadd.f32 %v1645_v19, %v2374_v2  ;;  %v948_v22 = vadd.f32 %v1741_v20, %v2374_v2 }
  0xd1   :  { %v622_v23 = vpop.f32.mrf.mxu0  ;;  %v942_v24 = vpop.f32.mrf.mxu1 }
  0xd2   :  { %1247 = vst.msk [vmem:[%s3019_s3 + $0x28] sm:$0xff] %vm1241_vm1, %v628_v21  ;;  %1311 = vst.msk [vmem:[%s3019_s3 + $0x228] sm:$0xff] %vm1241_vm1, %v948_v22  ;;  %v623_v25 = vadd.f32 %v2374_v2, %v622_v23  ;;  %v943_v26 = vadd.f32 %v2374_v2, %v942_v24 }
  0xd3   :  { %v1648_v27 = vpop.f32.mrf.mxu0  ;;  %v1744_v28 = vpop.f32.mrf.mxu1 }
  0xd4   :  { %1246 = vst.msk [vmem:[%s3019_s3 + $0x20] sm:$0xff] %vm1241_vm1, %v623_v25  ;;  %1310 = vst.msk [vmem:[%s3019_s3 + $0x220] sm:$0xff] %vm1241_vm1, %v943_v26  ;;  %v638_v29 = vadd.f32 %v1648_v27, %v2374_v2  ;;  %v958_v30 = vadd.f32 %v1744_v28, %v2374_v2 }
  0xd5   :  { %v632_v31 = vpop.f32.mrf.mxu0  ;;  %v952_v32 = vpop.f32.mrf.mxu1 }
  0xd6   :  { %1249 = vst.msk [vmem:[%s3019_s3 + $0x38] sm:$0xff] %vm1241_vm1, %v638_v29  ;;  %1313 = vst.msk [vmem:[%s3019_s3 + $0x238] sm:$0xff] %vm1241_vm1, %v958_v30  ;;  %v633_v33 = vadd.f32 %v2374_v2, %v632_v31  ;;  %v953_v34 = vadd.f32 %v2374_v2, %v952_v32 }
  0xd7   :  { %v1651_v35 = vpop.f32.mrf.mxu0  ;;  %v1747_v36 = vpop.f32.mrf.mxu1 }
  0xd8   :  { %1248 = vst.msk [vmem:[%s3019_s3 + $0x30] sm:$0xff] %vm1241_vm1, %v633_v33  ;;  %1312 = vst.msk [vmem:[%s3019_s3 + $0x230] sm:$0xff] %vm1241_vm1, %v953_v34  ;;  %v648_v37 = vadd.f32 %v1651_v35, %v2374_v2  ;;  %v968_v38 = vadd.f32 %v1747_v36, %v2374_v2 }
  0xd9   :  { %v642_v39 = vpop.f32.mrf.mxu0  ;;  %v962_v40 = vpop.f32.mrf.mxu1 }
  0xda   :  { %1251 = vst.msk [vmem:[%s3019_s3 + $0x48] sm:$0xff] %vm1241_vm1, %v648_v37  ;;  %1315 = vst.msk [vmem:[%s3019_s3 + $0x248] sm:$0xff] %vm1241_vm1, %v968_v38  ;;  %v643_v41 = vadd.f32 %v2374_v2, %v642_v39  ;;  %v963_v42 = vadd.f32 %v2374_v2, %v962_v40 }
  0xdb   :  { %v1654_v43 = vpop.f32.mrf.mxu0  ;;  %v1750_v44 = vpop.f32.mrf.mxu1 }
  0xdc   :  { %1250 = vst.msk [vmem:[%s3019_s3 + $0x40] sm:$0xff] %vm1241_vm1, %v643_v41  ;;  %1314 = vst.msk [vmem:[%s3019_s3 + $0x240] sm:$0xff] %vm1241_vm1, %v963_v42  ;;  %v658_v45 = vadd.f32 %v1654_v43, %v2374_v2  ;;  %v978_v46 = vadd.f32 %v1750_v44, %v2374_v2 }
  0xdd   :  { %v652_v47 = vpop.f32.mrf.mxu0  ;;  %v972_v48 = vpop.f32.mrf.mxu1 }
  0xde   :  { %1253 = vst.msk [vmem:[%s3019_s3 + $0x58] sm:$0xff] %vm1241_vm1, %v658_v45  ;;  %1317 = vst.msk [vmem:[%s3019_s3 + $0x258] sm:$0xff] %vm1241_vm1, %v978_v46  ;;  %v653_v49 = vadd.f32 %v2374_v2, %v652_v47  ;;  %v973_v50 = vadd.f32 %v2374_v2, %v972_v48 }
  0xdf   :  { %v1657_v51 = vpop.f32.mrf.mxu0  ;;  %v1753_v52 = vpop.f32.mrf.mxu1 }
  0xe0   :  { %1252 = vst.msk [vmem:[%s3019_s3 + $0x50] sm:$0xff] %vm1241_vm1, %v653_v49  ;;  %1316 = vst.msk [vmem:[%s3019_s3 + $0x250] sm:$0xff] %vm1241_vm1, %v973_v50  ;;  %v668_v53 = vadd.f32 %v1657_v51, %v2374_v2  ;;  %v988_v54 = vadd.f32 %v1753_v52, %v2374_v2 }
  0xe1   :  { %v662_v55 = vpop.f32.mrf.mxu0  ;;  %v982_v56 = vpop.f32.mrf.mxu1 }
  0xe2   :  { %1255 = vst.msk [vmem:[%s3019_s3 + $0x68] sm:$0xff] %vm1241_vm1, %v668_v53  ;;  %1319 = vst.msk [vmem:[%s3019_s3 + $0x268] sm:$0xff] %vm1241_vm1, %v988_v54  ;;  %v663_v57 = vadd.f32 %v2374_v2, %v662_v55  ;;  %v983_v58 = vadd.f32 %v2374_v2, %v982_v56 }
  0xe3   :  { %v1660_v59 = vpop.f32.mrf.mxu0  ;;  %v1756_v60 = vpop.f32.mrf.mxu1 }
  0xe4   :  { %1254 = vst.msk [vmem:[%s3019_s3 + $0x60] sm:$0xff] %vm1241_vm1, %v663_v57  ;;  %1318 = vst.msk [vmem:[%s3019_s3 + $0x260] sm:$0xff] %vm1241_vm1, %v983_v58  ;;  %v678_v61 = vadd.f32 %v1660_v59, %v2374_v2  ;;  %v998_v62 = vadd.f32 %v1756_v60, %v2374_v2 }
  0xe5   :  { %v672_v63 = vpop.f32.mrf.mxu0  ;;  %v992_v0 = vpop.f32.mrf.mxu1 }
  0xe6   :  { %1257 = vst.msk [vmem:[%s3019_s3 + $0x78] sm:$0xff] %vm1241_vm1, %v678_v61  ;;  %1321 = vst.msk [vmem:[%s3019_s3 + $0x278] sm:$0xff] %vm1241_vm1, %v998_v62  ;;  %v673_v1 = vadd.f32 %v2374_v2, %v672_v63  ;;  %v993_v3 = vadd.f32 %v2374_v2, %v992_v0 }
  0xe7   :  { %v1663_v4 = vpop.f32.mrf.mxu0  ;;  %v1759_v5 = vpop.f32.mrf.mxu1 }
  0xe8   :  { %1256 = vst.msk [vmem:[%s3019_s3 + $0x70] sm:$0xff] %vm1241_vm1, %v673_v1  ;;  %1320 = vst.msk [vmem:[%s3019_s3 + $0x270] sm:$0xff] %vm1241_vm1, %v993_v3  ;;  %v688_v6 = vadd.f32 %v1663_v4, %v2374_v2  ;;  %v1008_v7 = vadd.f32 %v1759_v5, %v2374_v2 }
  0xe9   :  { %v682_v8 = vpop.f32.mrf.mxu0  ;;  %v1002_v9 = vpop.f32.mrf.mxu1 }
  0xea   :  { %1259 = vst.msk [vmem:[%s3019_s3 + $0x88] sm:$0xff] %vm1241_vm1, %v688_v6  ;;  %1323 = vst.msk [vmem:[%s3019_s3 + $0x288] sm:$0xff] %vm1241_vm1, %v1008_v7  ;;  %v683_v10 = vadd.f32 %v2374_v2, %v682_v8  ;;  %v1003_v11 = vadd.f32 %v2374_v2, %v1002_v9 }
  0xeb   :  { %v1666_v12 = vpop.f32.mrf.mxu0  ;;  %v1762_v13 = vpop.f32.mrf.mxu1 }
  0xec   :  { %1258 = vst.msk [vmem:[%s3019_s3 + $0x80] sm:$0xff] %vm1241_vm1, %v683_v10  ;;  %1322 = vst.msk [vmem:[%s3019_s3 + $0x280] sm:$0xff] %vm1241_vm1, %v1003_v11  ;;  %v698_v14 = vadd.f32 %v1666_v12, %v2374_v2  ;;  %v1018_v15 = vadd.f32 %v1762_v13, %v2374_v2 }
  0xed   :  { %v692_v16 = vpop.f32.mrf.mxu0  ;;  %v1012_v17 = vpop.f32.mrf.mxu1 }
  0xee   :  { %1261 = vst.msk [vmem:[%s3019_s3 + $0x98] sm:$0xff] %vm1241_vm1, %v698_v14  ;;  %1325 = vst.msk [vmem:[%s3019_s3 + $0x298] sm:$0xff] %vm1241_vm1, %v1018_v15  ;;  %v693_v18 = vadd.f32 %v2374_v2, %v692_v16  ;;  %v1013_v19 = vadd.f32 %v2374_v2, %v1012_v17 }
  0xef   :  { %v1669_v20 = vpop.f32.mrf.mxu0  ;;  %v1765_v21 = vpop.f32.mrf.mxu1 }
  0xf0   :  { %1260 = vst.msk [vmem:[%s3019_s3 + $0x90] sm:$0xff] %vm1241_vm1, %v693_v18  ;;  %1324 = vst.msk [vmem:[%s3019_s3 + $0x290] sm:$0xff] %vm1241_vm1, %v1013_v19  ;;  %v708_v22 = vadd.f32 %v1669_v20, %v2374_v2  ;;  %v1028_v23 = vadd.f32 %v1765_v21, %v2374_v2 }
  0xf1   :  { %v702_v24 = vpop.f32.mrf.mxu0  ;;  %v1022_v25 = vpop.f32.mrf.mxu1 }
  0xf2   :  { %1263 = vst.msk [vmem:[%s3019_s3 + $0xa8] sm:$0xff] %vm1241_vm1, %v708_v22  ;;  %1327 = vst.msk [vmem:[%s3019_s3 + $0x2a8] sm:$0xff] %vm1241_vm1, %v1028_v23  ;;  %v703_v26 = vadd.f32 %v2374_v2, %v702_v24  ;;  %v1023_v27 = vadd.f32 %v2374_v2, %v1022_v25 }
  0xf3   :  { %v1672_v28 = vpop.f32.mrf.mxu0  ;;  %v1768_v29 = vpop.f32.mrf.mxu1 }
  0xf4   :  { %1262 = vst.msk [vmem:[%s3019_s3 + $0xa0] sm:$0xff] %vm1241_vm1, %v703_v26  ;;  %1326 = vst.msk [vmem:[%s3019_s3 + $0x2a0] sm:$0xff] %vm1241_vm1, %v1023_v27  ;;  %v718_v30 = vadd.f32 %v1672_v28, %v2374_v2  ;;  %v1038_v31 = vadd.f32 %v1768_v29, %v2374_v2 }
  0xf5   :  { %v712_v32 = vpop.f32.mrf.mxu0  ;;  %v1032_v33 = vpop.f32.mrf.mxu1 }
  0xf6   :  { %1265 = vst.msk [vmem:[%s3019_s3 + $0xb8] sm:$0xff] %vm1241_vm1, %v718_v30  ;;  %1329 = vst.msk [vmem:[%s3019_s3 + $0x2b8] sm:$0xff] %vm1241_vm1, %v1038_v31  ;;  %v713_v34 = vadd.f32 %v2374_v2, %v712_v32  ;;  %v1033_v35 = vadd.f32 %v2374_v2, %v1032_v33 }
  0xf7   :  { %v1675_v36 = vpop.f32.mrf.mxu0  ;;  %v1771_v37 = vpop.f32.mrf.mxu1 }
  0xf8   :  { %1264 = vst.msk [vmem:[%s3019_s3 + $0xb0] sm:$0xff] %vm1241_vm1, %v713_v34  ;;  %1328 = vst.msk [vmem:[%s3019_s3 + $0x2b0] sm:$0xff] %vm1241_vm1, %v1033_v35  ;;  %v728_v38 = vadd.f32 %v1675_v36, %v2374_v2  ;;  %v1048_v39 = vadd.f32 %v1771_v37, %v2374_v2 }
  0xf9   :  { %v722_v40 = vpop.f32.mrf.mxu0  ;;  %v1042_v41 = vpop.f32.mrf.mxu1 }
  0xfa   :  { %1267 = vst.msk [vmem:[%s3019_s3 + $0xc8] sm:$0xff] %vm1241_vm1, %v728_v38  ;;  %1331 = vst.msk [vmem:[%s3019_s3 + $0x2c8] sm:$0xff] %vm1241_vm1, %v1048_v39  ;;  %v723_v42 = vadd.f32 %v2374_v2, %v722_v40  ;;  %v1043_v43 = vadd.f32 %v2374_v2, %v1042_v41 }
  0xfb   :  { %v1678_v44 = vpop.f32.mrf.mxu0  ;;  %v1774_v45 = vpop.f32.mrf.mxu1 }
  0xfc   :  { %1266 = vst.msk [vmem:[%s3019_s3 + $0xc0] sm:$0xff] %vm1241_vm1, %v723_v42  ;;  %1330 = vst.msk [vmem:[%s3019_s3 + $0x2c0] sm:$0xff] %vm1241_vm1, %v1043_v43  ;;  %v738_v46 = vadd.f32 %v1678_v44, %v2374_v2  ;;  %v1058_v47 = vadd.f32 %v1774_v45, %v2374_v2 }
  0xfd   :  { %v732_v48 = vpop.f32.mrf.mxu0  ;;  %v1052_v49 = vpop.f32.mrf.mxu1 }
  0xfe   :  { %1269 = vst.msk [vmem:[%s3019_s3 + $0xd8] sm:$0xff] %vm1241_vm1, %v738_v46  ;;  %1333 = vst.msk [vmem:[%s3019_s3 + $0x2d8] sm:$0xff] %vm1241_vm1, %v1058_v47  ;;  %v733_v50 = vadd.f32 %v2374_v2, %v732_v48  ;;  %v1053_v51 = vadd.f32 %v2374_v2, %v1052_v49 }
  0xff   :  { %v1681_v52 = vpop.f32.mrf.mxu0  ;;  %v1777_v53 = vpop.f32.mrf.mxu1 }
 0x100   :  { %1268 = vst.msk [vmem:[%s3019_s3 + $0xd0] sm:$0xff] %vm1241_vm1, %v733_v50  ;;  %1332 = vst.msk [vmem:[%s3019_s3 + $0x2d0] sm:$0xff] %vm1241_vm1, %v1053_v51  ;;  %v748_v54 = vadd.f32 %v1681_v52, %v2374_v2  ;;  %v1068_v55 = vadd.f32 %v1777_v53, %v2374_v2 }
 0x101   :  { %v742_v56 = vpop.f32.mrf.mxu0  ;;  %v1062_v57 = vpop.f32.mrf.mxu1 }
 0x102   :  { %1271 = vst.msk [vmem:[%s3019_s3 + $0xe8] sm:$0xff] %vm1241_vm1, %v748_v54  ;;  %1335 = vst.msk [vmem:[%s3019_s3 + $0x2e8] sm:$0xff] %vm1241_vm1, %v1068_v55  ;;  %v743_v58 = vadd.f32 %v2374_v2, %v742_v56  ;;  %v1063_v59 = vadd.f32 %v2374_v2, %v1062_v57 }
 0x103   :  { %v1684_v60 = vpop.f32.mrf.mxu0  ;;  %v1780_v61 = vpop.f32.mrf.mxu1 }
 0x104   :  { %1270 = vst.msk [vmem:[%s3019_s3 + $0xe0] sm:$0xff] %vm1241_vm1, %v743_v58  ;;  %1334 = vst.msk [vmem:[%s3019_s3 + $0x2e0] sm:$0xff] %vm1241_vm1, %v1063_v59  ;;  %v758_v62 = vadd.f32 %v1684_v60, %v2374_v2  ;;  %v1078_v63 = vadd.f32 %v1780_v61, %v2374_v2 }
 0x105   :  { %v752_v0 = vpop.f32.mrf.mxu0  ;;  %v1072_v1 = vpop.f32.mrf.mxu1 }
 0x106   :  { %1273 = vst.msk [vmem:[%s3019_s3 + $0xf8] sm:$0xff] %vm1241_vm1, %v758_v62  ;;  %1337 = vst.msk [vmem:[%s3019_s3 + $0x2f8] sm:$0xff] %vm1241_vm1, %v1078_v63  ;;  %v753_v3 = vadd.f32 %v2374_v2, %v752_v0  ;;  %v1073_v4 = vadd.f32 %v2374_v2, %v1072_v1 }
 0x107   :  { %v1687_v5 = vpop.f32.mrf.mxu0  ;;  %v1783_v6 = vpop.f32.mrf.mxu1 }
 0x108   :  { %1272 = vst.msk [vmem:[%s3019_s3 + $0xf0] sm:$0xff] %vm1241_vm1, %v753_v3  ;;  %1336 = vst.msk [vmem:[%s3019_s3 + $0x2f0] sm:$0xff] %vm1241_vm1, %v1073_v4  ;;  %v768_v7 = vadd.f32 %v1687_v5, %v2374_v2  ;;  %v1088_v8 = vadd.f32 %v1783_v6, %v2374_v2 }
 0x109   :  { %v762_v9 = vpop.f32.mrf.mxu0  ;;  %v1082_v10 = vpop.f32.mrf.mxu1 }
 0x10a   :  { %1275 = vst.msk [vmem:[%s3019_s3 + $0x108] sm:$0xff] %vm1241_vm1, %v768_v7  ;;  %1339 = vst.msk [vmem:[%s3019_s3 + $0x308] sm:$0xff] %vm1241_vm1, %v1088_v8  ;;  %v763_v11 = vadd.f32 %v2374_v2, %v762_v9  ;;  %v1083_v12 = vadd.f32 %v2374_v2, %v1082_v10 }
 0x10b   :  { %v1690_v13 = vpop.f32.mrf.mxu0  ;;  %v1786_v14 = vpop.f32.mrf.mxu1 }
 0x10c   :  { %1274 = vst.msk [vmem:[%s3019_s3 + $0x100] sm:$0xff] %vm1241_vm1, %v763_v11  ;;  %1338 = vst.msk [vmem:[%s3019_s3 + $0x300] sm:$0xff] %vm1241_vm1, %v1083_v12  ;;  %v778_v15 = vadd.f32 %v1690_v13, %v2374_v2  ;;  %v1098_v16 = vadd.f32 %v1786_v14, %v2374_v2 }
 0x10d   :  { %v772_v17 = vpop.f32.mrf.mxu0  ;;  %v1092_v18 = vpop.f32.mrf.mxu1 }
 0x10e   :  { %1277 = vst.msk [vmem:[%s3019_s3 + $0x118] sm:$0xff] %vm1241_vm1, %v778_v15  ;;  %1341 = vst.msk [vmem:[%s3019_s3 + $0x318] sm:$0xff] %vm1241_vm1, %v1098_v16  ;;  %v773_v19 = vadd.f32 %v2374_v2, %v772_v17  ;;  %v1093_v20 = vadd.f32 %v2374_v2, %v1092_v18 }
 0x10f   :  { %v1693_v21 = vpop.f32.mrf.mxu0  ;;  %v1789_v22 = vpop.f32.mrf.mxu1 }
 0x110   :  { %1276 = vst.msk [vmem:[%s3019_s3 + $0x110] sm:$0xff] %vm1241_vm1, %v773_v19  ;;  %1340 = vst.msk [vmem:[%s3019_s3 + $0x310] sm:$0xff] %vm1241_vm1, %v1093_v20  ;;  %v788_v23 = vadd.f32 %v1693_v21, %v2374_v2  ;;  %v1108_v24 = vadd.f32 %v1789_v22, %v2374_v2 }
 0x111   :  { %v782_v25 = vpop.f32.mrf.mxu0  ;;  %v1102_v26 = vpop.f32.mrf.mxu1 }
 0x112   :  { %1279 = vst.msk [vmem:[%s3019_s3 + $0x128] sm:$0xff] %vm1241_vm1, %v788_v23  ;;  %1343 = vst.msk [vmem:[%s3019_s3 + $0x328] sm:$0xff] %vm1241_vm1, %v1108_v24  ;;  %v783_v27 = vadd.f32 %v2374_v2, %v782_v25  ;;  %v1103_v28 = vadd.f32 %v2374_v2, %v1102_v26 }
 0x113   :  { %v1696_v29 = vpop.f32.mrf.mxu0  ;;  %v1792_v30 = vpop.f32.mrf.mxu1 }
 0x114   :  { %1278 = vst.msk [vmem:[%s3019_s3 + $0x120] sm:$0xff] %vm1241_vm1, %v783_v27  ;;  %1342 = vst.msk [vmem:[%s3019_s3 + $0x320] sm:$0xff] %vm1241_vm1, %v1103_v28  ;;  %v798_v31 = vadd.f32 %v1696_v29, %v2374_v2  ;;  %v1118_v32 = vadd.f32 %v1792_v30, %v2374_v2 }
 0x115   :  { %v792_v33 = vpop.f32.mrf.mxu0  ;;  %v1112_v34 = vpop.f32.mrf.mxu1 }
 0x116   :  { %1281 = vst.msk [vmem:[%s3019_s3 + $0x138] sm:$0xff] %vm1241_vm1, %v798_v31  ;;  %1345 = vst.msk [vmem:[%s3019_s3 + $0x338] sm:$0xff] %vm1241_vm1, %v1118_v32  ;;  %v793_v35 = vadd.f32 %v2374_v2, %v792_v33  ;;  %v1113_v36 = vadd.f32 %v2374_v2, %v1112_v34 }
 0x117   :  { %v1699_v37 = vpop.f32.mrf.mxu0  ;;  %v1795_v38 = vpop.f32.mrf.mxu1 }
 0x118   :  { %1280 = vst.msk [vmem:[%s3019_s3 + $0x130] sm:$0xff] %vm1241_vm1, %v793_v35  ;;  %1344 = vst.msk [vmem:[%s3019_s3 + $0x330] sm:$0xff] %vm1241_vm1, %v1113_v36  ;;  %v808_v39 = vadd.f32 %v1699_v37, %v2374_v2  ;;  %v1128_v40 = vadd.f32 %v1795_v38, %v2374_v2 }
 0x119   :  { %v802_v41 = vpop.f32.mrf.mxu0  ;;  %v1122_v42 = vpop.f32.mrf.mxu1 }
 0x11a   :  { %1283 = vst.msk [vmem:[%s3019_s3 + $0x148] sm:$0xff] %vm1241_vm1, %v808_v39  ;;  %1347 = vst.msk [vmem:[%s3019_s3 + $0x348] sm:$0xff] %vm1241_vm1, %v1128_v40  ;;  %v803_v43 = vadd.f32 %v2374_v2, %v802_v41  ;;  %v1123_v44 = vadd.f32 %v2374_v2, %v1122_v42 }
 0x11b   :  { %v1702_v45 = vpop.f32.mrf.mxu0  ;;  %v1798_v46 = vpop.f32.mrf.mxu1 }
 0x11c   :  { %1282 = vst.msk [vmem:[%s3019_s3 + $0x140] sm:$0xff] %vm1241_vm1, %v803_v43  ;;  %1346 = vst.msk [vmem:[%s3019_s3 + $0x340] sm:$0xff] %vm1241_vm1, %v1123_v44  ;;  %v818_v47 = vadd.f32 %v1702_v45, %v2374_v2  ;;  %v1138_v48 = vadd.f32 %v1798_v46, %v2374_v2 }
 0x11d   :  { %v812_v49 = vpop.f32.mrf.mxu0  ;;  %v1132_v50 = vpop.f32.mrf.mxu1 }
 0x11e   :  { %1285 = vst.msk [vmem:[%s3019_s3 + $0x158] sm:$0xff] %vm1241_vm1, %v818_v47  ;;  %1349 = vst.msk [vmem:[%s3019_s3 + $0x358] sm:$0xff] %vm1241_vm1, %v1138_v48  ;;  %v813_v51 = vadd.f32 %v2374_v2, %v812_v49  ;;  %v1133_v52 = vadd.f32 %v2374_v2, %v1132_v50 }
 0x11f   :  { %v1705_v53 = vpop.f32.mrf.mxu0  ;;  %v1801_v54 = vpop.f32.mrf.mxu1 }
 0x120   :  { %1284 = vst.msk [vmem:[%s3019_s3 + $0x150] sm:$0xff] %vm1241_vm1, %v813_v51  ;;  %1348 = vst.msk [vmem:[%s3019_s3 + $0x350] sm:$0xff] %vm1241_vm1, %v1133_v52  ;;  %v828_v55 = vadd.f32 %v1705_v53, %v2374_v2  ;;  %v1148_v56 = vadd.f32 %v1801_v54, %v2374_v2 }
 0x121   :  { %v822_v57 = vpop.f32.mrf.mxu0  ;;  %v1142_v58 = vpop.f32.mrf.mxu1 }
 0x122   :  { %1287 = vst.msk [vmem:[%s3019_s3 + $0x168] sm:$0xff] %vm1241_vm1, %v828_v55  ;;  %1351 = vst.msk [vmem:[%s3019_s3 + $0x368] sm:$0xff] %vm1241_vm1, %v1148_v56  ;;  %v823_v59 = vadd.f32 %v2374_v2, %v822_v57  ;;  %v1143_v60 = vadd.f32 %v2374_v2, %v1142_v58 }
 0x123   :  { %v1708_v61 = vpop.f32.mrf.mxu0  ;;  %v1804_v62 = vpop.f32.mrf.mxu1 }
 0x124   :  { %1286 = vst.msk [vmem:[%s3019_s3 + $0x160] sm:$0xff] %vm1241_vm1, %v823_v59  ;;  %1350 = vst.msk [vmem:[%s3019_s3 + $0x360] sm:$0xff] %vm1241_vm1, %v1143_v60  ;;  %v838_v63 = vadd.f32 %v1708_v61, %v2374_v2  ;;  %v1158_v0 = vadd.f32 %v1804_v62, %v2374_v2 }
 0x125   :  { %v832_v1 = vpop.f32.mrf.mxu0  ;;  %v1152_v3 = vpop.f32.mrf.mxu1 }
 0x126   :  { %1289 = vst.msk [vmem:[%s3019_s3 + $0x178] sm:$0xff] %vm1241_vm1, %v838_v63  ;;  %1353 = vst.msk [vmem:[%s3019_s3 + $0x378] sm:$0xff] %vm1241_vm1, %v1158_v0  ;;  %v833_v4 = vadd.f32 %v2374_v2, %v832_v1  ;;  %v1153_v5 = vadd.f32 %v2374_v2, %v1152_v3 }
 0x127   :  { %v1711_v6 = vpop.f32.mrf.mxu0  ;;  %v1807_v7 = vpop.f32.mrf.mxu1 }
 0x128   :  { %1288 = vst.msk [vmem:[%s3019_s3 + $0x170] sm:$0xff] %vm1241_vm1, %v833_v4  ;;  %1352 = vst.msk [vmem:[%s3019_s3 + $0x370] sm:$0xff] %vm1241_vm1, %v1153_v5  ;;  %v848_v8 = vadd.f32 %v1711_v6, %v2374_v2  ;;  %v1168_v9 = vadd.f32 %v1807_v7, %v2374_v2 }
 0x129   :  { %v842_v10 = vpop.f32.mrf.mxu0  ;;  %v1162_v11 = vpop.f32.mrf.mxu1 }
 0x12a   :  { %1291 = vst.msk [vmem:[%s3019_s3 + $0x188] sm:$0xff] %vm1241_vm1, %v848_v8  ;;  %1355 = vst.msk [vmem:[%s3019_s3 + $0x388] sm:$0xff] %vm1241_vm1, %v1168_v9  ;;  %v843_v12 = vadd.f32 %v2374_v2, %v842_v10  ;;  %v1163_v13 = vadd.f32 %v2374_v2, %v1162_v11 }
 0x12b   :  { %v1714_v14 = vpop.f32.mrf.mxu0  ;;  %v1810_v15 = vpop.f32.mrf.mxu1 }
 0x12c   :  { %1290 = vst.msk [vmem:[%s3019_s3 + $0x180] sm:$0xff] %vm1241_vm1, %v843_v12  ;;  %1354 = vst.msk [vmem:[%s3019_s3 + $0x380] sm:$0xff] %vm1241_vm1, %v1163_v13  ;;  %v858_v16 = vadd.f32 %v1714_v14, %v2374_v2  ;;  %v1178_v17 = vadd.f32 %v1810_v15, %v2374_v2 }
 0x12d   :  { %v852_v18 = vpop.f32.mrf.mxu0  ;;  %v1172_v19 = vpop.f32.mrf.mxu1 }
 0x12e   :  { %1293 = vst.msk [vmem:[%s3019_s3 + $0x198] sm:$0xff] %vm1241_vm1, %v858_v16  ;;  %1357 = vst.msk [vmem:[%s3019_s3 + $0x398] sm:$0xff] %vm1241_vm1, %v1178_v17  ;;  %v853_v20 = vadd.f32 %v2374_v2, %v852_v18  ;;  %v1173_v21 = vadd.f32 %v2374_v2, %v1172_v19 }
 0x12f   :  { %v1717_v22 = vpop.f32.mrf.mxu0  ;;  %v1813_v23 = vpop.f32.mrf.mxu1 }
 0x130   :  { %1292 = vst.msk [vmem:[%s3019_s3 + $0x190] sm:$0xff] %vm1241_vm1, %v853_v20  ;;  %1356 = vst.msk [vmem:[%s3019_s3 + $0x390] sm:$0xff] %vm1241_vm1, %v1173_v21  ;;  %v868_v24 = vadd.f32 %v1717_v22, %v2374_v2  ;;  %v1188_v25 = vadd.f32 %v1813_v23, %v2374_v2 }
 0x131   :  { %v862_v26 = vpop.f32.mrf.mxu0  ;;  %v1182_v27 = vpop.f32.mrf.mxu1 }
 0x132   :  { %1295 = vst.msk [vmem:[%s3019_s3 + $0x1a8] sm:$0xff] %vm1241_vm1, %v868_v24  ;;  %1359 = vst.msk [vmem:[%s3019_s3 + $0x3a8] sm:$0xff] %vm1241_vm1, %v1188_v25  ;;  %v863_v28 = vadd.f32 %v2374_v2, %v862_v26  ;;  %v1183_v29 = vadd.f32 %v2374_v2, %v1182_v27 }
 0x133   :  { %v1720_v30 = vpop.f32.mrf.mxu0  ;;  %v1816_v31 = vpop.f32.mrf.mxu1 }
 0x134   :  { %1294 = vst.msk [vmem:[%s3019_s3 + $0x1a0] sm:$0xff] %vm1241_vm1, %v863_v28  ;;  %1358 = vst.msk [vmem:[%s3019_s3 + $0x3a0] sm:$0xff] %vm1241_vm1, %v1183_v29  ;;  %v878_v32 = vadd.f32 %v1720_v30, %v2374_v2  ;;  %v1198_v33 = vadd.f32 %v1816_v31, %v2374_v2 }
 0x135   :  { %v872_v34 = vpop.f32.mrf.mxu0  ;;  %v1192_v35 = vpop.f32.mrf.mxu1 }
 0x136   :  { %1297 = vst.msk [vmem:[%s3019_s3 + $0x1b8] sm:$0xff] %vm1241_vm1, %v878_v32  ;;  %1361 = vst.msk [vmem:[%s3019_s3 + $0x3b8] sm:$0xff] %vm1241_vm1, %v1198_v33  ;;  %v873_v36 = vadd.f32 %v2374_v2, %v872_v34  ;;  %v1193_v37 = vadd.f32 %v2374_v2, %v1192_v35 }
 0x137   :  { %v1723_v38 = vpop.f32.mrf.mxu0  ;;  %v1819_v39 = vpop.f32.mrf.mxu1 }
 0x138   :  { %1296 = vst.msk [vmem:[%s3019_s3 + $0x1b0] sm:$0xff] %vm1241_vm1, %v873_v36  ;;  %1360 = vst.msk [vmem:[%s3019_s3 + $0x3b0] sm:$0xff] %vm1241_vm1, %v1193_v37  ;;  %v888_v40 = vadd.f32 %v1723_v38, %v2374_v2  ;;  %v1208_v41 = vadd.f32 %v1819_v39, %v2374_v2 }
 0x139   :  { %v882_v42 = vpop.f32.mrf.mxu0  ;;  %v1202_v43 = vpop.f32.mrf.mxu1 }
 0x13a   :  { %1299 = vst.msk [vmem:[%s3019_s3 + $0x1c8] sm:$0xff] %vm1241_vm1, %v888_v40  ;;  %1363 = vst.msk [vmem:[%s3019_s3 + $0x3c8] sm:$0xff] %vm1241_vm1, %v1208_v41  ;;  %v883_v44 = vadd.f32 %v2374_v2, %v882_v42  ;;  %v1203_v45 = vadd.f32 %v2374_v2, %v1202_v43 }
 0x13b   :  { %v1726_v46 = vpop.f32.mrf.mxu0  ;;  %v1822_v47 = vpop.f32.mrf.mxu1 }
 0x13c   :  { %1298 = vst.msk [vmem:[%s3019_s3 + $0x1c0] sm:$0xff] %vm1241_vm1, %v883_v44  ;;  %1362 = vst.msk [vmem:[%s3019_s3 + $0x3c0] sm:$0xff] %vm1241_vm1, %v1203_v45  ;;  %v898_v48 = vadd.f32 %v1726_v46, %v2374_v2  ;;  %v1218_v49 = vadd.f32 %v1822_v47, %v2374_v2 }
 0x13d   :  { %v892_v50 = vpop.f32.mrf.mxu0  ;;  %v1212_v51 = vpop.f32.mrf.mxu1 }
 0x13e   :  { %1301 = vst.msk [vmem:[%s3019_s3 + $0x1d8] sm:$0xff] %vm1241_vm1, %v898_v48  ;;  %1365 = vst.msk [vmem:[%s3019_s3 + $0x3d8] sm:$0xff] %vm1241_vm1, %v1218_v49  ;;  %v893_v52 = vadd.f32 %v2374_v2, %v892_v50  ;;  %v1213_v53 = vadd.f32 %v2374_v2, %v1212_v51 }
 0x13f   :  { %v1729_v54 = vpop.f32.mrf.mxu0  ;;  %v1825_v55 = vpop.f32.mrf.mxu1 }
 0x140   :  { %1300 = vst.msk [vmem:[%s3019_s3 + $0x1d0] sm:$0xff] %vm1241_vm1, %v893_v52  ;;  %1364 = vst.msk [vmem:[%s3019_s3 + $0x3d0] sm:$0xff] %vm1241_vm1, %v1213_v53  ;;  %v908_v56 = vadd.f32 %v1729_v54, %v2374_v2  ;;  %v1228_v57 = vadd.f32 %v1825_v55, %v2374_v2 }
 0x141   :  { %v902_v58 = vpop.f32.mrf.mxu0  ;;  %v1222_v59 = vpop.f32.mrf.mxu1 }
 0x142   :  { %1303 = vst.msk [vmem:[%s3019_s3 + $0x1e8] sm:$0xff] %vm1241_vm1, %v908_v56  ;;  %1367 = vst.msk [vmem:[%s3019_s3 + $0x3e8] sm:$0xff] %vm1241_vm1, %v1228_v57  ;;  %v903_v60 = vadd.f32 %v2374_v2, %v902_v58  ;;  %v1223_v61 = vadd.f32 %v2374_v2, %v1222_v59 }
 0x143   :  { %v1732_v62 = vpop.f32.mrf.mxu0  ;;  %v1828_v63 = vpop.f32.mrf.mxu1 }
 0x144   :  { %1302 = vst.msk [vmem:[%s3019_s3 + $0x1e0] sm:$0xff] %vm1241_vm1, %v903_v60  ;;  %1366 = vst.msk [vmem:[%s3019_s3 + $0x3e0] sm:$0xff] %vm1241_vm1, %v1223_v61  ;;  %v918_v0 = vadd.f32 %v1732_v62, %v2374_v2  ;;  %v1238_v1 = vadd.f32 %v1828_v63, %v2374_v2 }
 0x145   :  { %v912_v3 = vpop.f32.mrf.mxu0  ;;  %v1232_v4 = vpop.f32.mrf.mxu1 }
 0x146   :  { %1305 = vst.msk [vmem:[%s3019_s3 + $0x1f8] sm:$0xff] %vm1241_vm1, %v918_v0  ;;  %1369 = vst.msk [vmem:[%s3019_s3 + $0x3f8] sm:$0xff] %vm1241_vm1, %v1238_v1  ;;  %v913_v5 = vadd.f32 %v2374_v2, %v912_v3  ;;  %v1233_v6 = vadd.f32 %v2374_v2, %v1232_v4 }
 0x148   :  { %1304 = vst.msk [vmem:[%s3019_s3 + $0x1f0] sm:$0xff] %vm1241_vm1, %v913_v5  ;;  %1368 = vst.msk [vmem:[%s3019_s3 + $0x3f0] sm:$0xff] %vm1241_vm1, %v1233_v6 }

</bundles_post_ra>
